<compile_context>
chip_gen: v7x
topology: tpu7x:2x2x1
jax: 0.10.0
libtpu: 0.0.40
codegen_flags: <defaults>
</compile_context>

<pallas_src>
import functools

import jax
import jax.numpy as jnp
from jax import lax
from jax.experimental import pallas as pl
from jax.experimental.pallas import tpu as pltpu


# ----------------------------------------------------------------------------
# Tiling / budgeting helpers
# ----------------------------------------------------------------------------
def _tile(total, candidates):
    """Largest candidate tile that divides `total`; falls back to `total`."""
    for t in candidates:
        if total % t == 0:
            return t
    return total


def _head_block_width(H, head_dim):
    """Smallest multiple of head_dim that is a multiple of 128 and divides H;
    falls back to H (single block covering all heads) for unaligned sizes."""
    w = head_dim
    while w < H and (w % 128 != 0 or H % w != 0):
        w += head_dim
    return w


def _qkv_col_tile(H, H3):
    """Column tile of the fused (H, 3H) weight: fully resident while the bf16
    block is <= ~8 MiB, otherwise tiled (guards very large H and v7x VMEM)."""
    if H * H3 * 2 <= (8 << 20):
        return H3
    for tn in (1536, 1024, 768, 512, 384, 256, 128):
        if H3 % tn == 0 and H * tn * 2 <= (8 << 20):
            return tn
    return H3


def _vmem_limit_bytes():
    """Scoped VMEM limit: ~75% of the running chip's physical VMEM
    (128 MiB on v5e/v6e, 64 MiB on v7x); conservative fallback otherwise."""
    try:
        cap = pltpu.get_tpu_info().vmem_capacity_bytes
    except Exception:
        cap = 64 * 1024 * 1024
    return int(cap * 3 // 4)


# ----------------------------------------------------------------------------
# Kernel 1: fused QKV projection
#   qkv[b, t0:t0+tm, n0:n0+tn] = x_tile @ W_qkv_t[:, n0:n0+tn] + b_qkv[n0:n0+tn]
# (weight pre-transposed & pre-scaled outside the kernel, consumed in place)
# ----------------------------------------------------------------------------
def _qkv_proj_kernel(x_ref, w_ref, b_ref, o_ref):
    # x_ref: (1, tm, H) bf16, w_ref: (H, tn) bf16, b_ref: (1, tn) f32,
    # o_ref: (1, tm, tn) bf16
    acc = jnp.dot(x_ref[0], w_ref[...], preferred_element_type=jnp.float32)
    acc = acc + b_ref[...]                                         # bias add in f32
    o_ref[0] = acc.astype(o_ref.dtype)


def fused_qkv_projection(x_bf16, w_t, bias):
    B, T, H = x_bf16.shape
    H3 = w_t.shape[1]
    tm = _tile(T, (512, 256, 128))
    tn = _qkv_col_tile(H, H3)
    return pl.pallas_call(
        _qkv_proj_kernel,
        out_shape=jax.ShapeDtypeStruct((B, T, H3), jnp.bfloat16),
        grid_spec=pltpu.PrefetchScalarGridSpec(
            num_scalar_prefetch=0,
            grid=(B, T // tm, H3 // tn),
            in_specs=[
                pl.BlockSpec((1, tm, H), lambda b, t, n: (b, t, 0)),   # x tile (resident across n)
                pl.BlockSpec((H, tn), lambda b, t, n: (0, n)),         # weight columns
                pl.BlockSpec((1, tn), lambda b, t, n: (0, n)),         # bias columns
            ],
            out_specs=pl.BlockSpec((1, tm, tn), lambda b, t, n: (b, t, n)),
        ),
        compiler_params=pltpu.CompilerParams(
            dimension_semantics=("parallel", "parallel", "arbitrary"),
            vmem_limit_bytes=_vmem_limit_bytes()),
    )(x_bf16, w_t, bias)


# ----------------------------------------------------------------------------
# Kernel 2: flash-style attention over a lane-dense block of heads, sliced
# straight out of the packed (B, T, 3H) QKV slab.
#   grid = (B, head_blocks, T // tq, T // tk), kv axis innermost ("arbitrary")
#   online softmax state (m, l, acc) lives in VMEM scratch per head.
# ----------------------------------------------------------------------------
def _flash_attention_kernel(q_ref, k_ref, v_ref, mask_ref, o_ref,
                            m_sc, l_sc, acc_sc, *, heads_per_block, head_dim):
    # q_ref: (1, tq, width) bf16 (pre-scaled), k/v_ref: (1, tk, width) bf16,
    # mask_ref: (1, 1, 1, tk) f32, o_ref: (1, tq, width) bf16,
    # m_sc/l_sc: (heads_per_block, tq, 1) f32, acc_sc: (heads_per_block, tq, head_dim) f32
    kv = pl.program_id(3)

    @pl.when(kv == 0)
    def _init():
        m_sc[...] = jnp.full_like(m_sc, -jnp.inf)
        l_sc[...] = jnp.zeros_like(l_sc)
        acc_sc[...] = jnp.zeros_like(acc_sc)

    mask = mask_ref[0, 0]                                          # (1, tk) f32

    # NOTE: static 64-lane-offset head slices below; XLU relayout (if any) has
    # slack vs. the MXU here — verify in the bundle dump before restructuring.
    for i in range(heads_per_block):                               # unrolled, static slices
        lo = i * head_dim
        hi = lo + head_dim
        q = q_ref[0, :, lo:hi]                                     # (tq, h) bf16 (pre-scaled)
        k = k_ref[0, :, lo:hi]                                     # (tk, h) bf16
        v = v_ref[0, :, lo:hi]                                     # (tk, h) bf16

        # q @ k^T via dot_general contracting last dims (no in-kernel transpose).
        s = lax.dot_general(q, k, (((1,), (1,)), ((), ())),
                            preferred_element_type=jnp.float32)    # (tq, tk) f32
        s = s + mask                                               # additive mask, f32

        m_prev = m_sc[i]                                           # (tq, 1)
        l_prev = l_sc[i]
        m_new = jnp.maximum(m_prev, jnp.max(s, axis=-1, keepdims=True))
        alpha = jnp.exp(m_prev - m_new)                            # rescale of old state
        p = jnp.exp(s - m_new)                                     # f32 exp (v5e-safe)

        l_sc[i] = alpha * l_prev + jnp.sum(p, axis=-1, keepdims=True)
        pv = jnp.dot(p.astype(jnp.bfloat16), v,
                     preferred_element_type=jnp.float32)           # (tq, h) f32
        acc_sc[i] = alpha * acc_sc[i] + pv
        m_sc[i] = m_new

    @pl.when(kv == pl.num_programs(3) - 1)
    def _finalize():
        outs = []
        for i in range(heads_per_block):
            # Normalize the small (tq, h) accumulator, not the (tq, tk) probs.
            inv = pl.reciprocal(l_sc[i], approx=True)              # EUP
            outs.append(acc_sc[i] * inv)
        blk = outs[0] if heads_per_block == 1 else jnp.concatenate(outs, axis=-1)
        o_ref[0] = blk.astype(o_ref.dtype)                         # lane-dense bf16 store


def multihead_attention(qkv, mask, num_heads, head_dim):
    B, T, H3 = qkv.shape
    H = H3 // 3
    width = _head_block_width(H, head_dim)
    heads_per_block = width // head_dim
    n_blocks = H // width
    # Query tile kept >= 128 (ideally 256); KV tile bounds the live score set.
    tq = _tile(T, (256, 128))
    tk = _tile(T, (256, 128))
    n_q = T // tq
    n_kv = T // tk

    kern = functools.partial(_flash_attention_kernel,
                             heads_per_block=heads_per_block,
                             head_dim=head_dim)
    return pl.pallas_call(
        kern,
        out_shape=jax.ShapeDtypeStruct((B, T, H), jnp.bfloat16),
        grid_spec=pltpu.PrefetchScalarGridSpec(
            num_scalar_prefetch=0,
            grid=(B, n_blocks, n_q, n_kv),
            in_specs=[
                # q / k / v head blocks sliced out of the packed QKV slab.
                pl.BlockSpec((1, tq, width), lambda b, j, qi, ki: (b, qi, j)),
                pl.BlockSpec((1, tk, width), lambda b, j, qi, ki: (b, ki, n_blocks + j)),
                pl.BlockSpec((1, tk, width), lambda b, j, qi, ki: (b, ki, 2 * n_blocks + j)),
                # additive mask: varies only with (b, kv-tile).
                pl.BlockSpec((1, 1, 1, tk), lambda b, j, qi, ki: (b, 0, 0, ki)),
            ],
            # Output block constant across the kv axis -> accumulator semantics.
            out_specs=pl.BlockSpec((1, tq, width), lambda b, j, qi, ki: (b, qi, j)),
            scratch_shapes=[
                pltpu.VMEM((heads_per_block, tq, 1), jnp.float32),         # running max
                pltpu.VMEM((heads_per_block, tq, 1), jnp.float32),         # running denom
                pltpu.VMEM((heads_per_block, tq, head_dim), jnp.float32),  # output acc
            ],
        ),
        compiler_params=pltpu.CompilerParams(
            dimension_semantics=("parallel", "parallel", "parallel", "arbitrary"),
            vmem_limit_bytes=_vmem_limit_bytes()),
    )(qkv, qkv, qkv, mask)


# ----------------------------------------------------------------------------
# Module wrapper
# ----------------------------------------------------------------------------
class BertSelfAttentionPallas:
    def __init__(self, hidden_size, num_attention_heads, key,
                 attention_probs_dropout_prob=0.0):
        assert hidden_size % num_attention_heads == 0
        self.num_attention_heads = num_attention_heads
        self.attention_head_size = hidden_size // num_attention_heads
        self.all_head_size = hidden_size
        self.dropout_p = attention_probs_dropout_prob  # inference: no-op
        # Lane-alignment guard (correctness-review item): the kernels assume a
        # 128-divisible hidden size so every block is lane-dense.
        assert hidden_size % 128 == 0, "hidden_size must be a multiple of 128"

        ks = jax.random.split(key, 6)
        bound = 1.0 / (hidden_size ** 0.5)

        def init_w(k):
            return jax.random.uniform(k, (hidden_size, hidden_size),
                                      jnp.float32, -bound, bound)

        def init_b(k):
            return jax.random.uniform(k, (hidden_size,), jnp.float32, -bound, bound)

        # f32 master parameters (PyTorch nn.Linear convention: W is [out, in]).
        self.wq, self.bq = init_w(ks[0]), init_b(ks[1])
        self.wk, self.bk = init_w(ks[2]), init_b(ks[3])
        self.wv, self.bv = init_w(ks[4]), init_b(ks[5])

        # Kernel-side packed params: fold 1/sqrt(head_dim) into the query
        # projection, stack to (3H, H), transpose once, cast weights to bf16.
        scale = self.attention_head_size ** -0.5
        w_fused = jnp.concatenate([self.wq * scale, self.wk, self.wv], axis=0)
        self.w_qkv_t = jnp.asarray(w_fused.T, dtype=jnp.bfloat16)            # (H, 3H)
        self.b_qkv = jnp.concatenate([self.bq * scale, self.bk, self.bv]
                                     ).reshape(1, 3 * hidden_size).astype(jnp.float32)

    def __call__(self, hidden_states, attention_mask):
        # hidden_states: (B, T, H) f32; attention_mask: (B, 1, 1, T) additive mask.
        x_bf16 = hidden_states.astype(jnp.bfloat16)            # cast once upstream
        qkv = fused_qkv_projection(x_bf16, self.w_qkv_t, self.b_qkv)  # (B,T,3H) bf16
        return multihead_attention(qkv, attention_mask,
                                   self.num_attention_heads,
                                   self.attention_head_size)          # (B,T,H) bf16


# ----------------------------------------------------------------------------
# Pure-JAX f32 reference for verification
# ----------------------------------------------------------------------------
def reference(mod, x, mask):
    def proj(w, b):
        p = x @ w.T + b
        B, T, _ = x.shape
        p = p.reshape(B, T, mod.num_attention_heads, mod.attention_head_size)
        return jnp.transpose(p, (0, 2, 1, 3))
    q, k, v = proj(mod.wq, mod.bq), proj(mod.wk, mod.bk), proj(mod.wv, mod.bv)
    scale = mod.attention_head_size ** -0.5
    s = jnp.einsum('bnqd,bnkd->bnqk', q, k) * scale + mask
    p = jax.nn.softmax(s, axis=-1)
    o = jnp.einsum('bnqk,bnkd->bnqd', p, v)
    B, n, T, h = o.shape
    return jnp.transpose(o, (0, 2, 1, 3)).reshape(B, T, n * h)


if __name__ == "__main__":
    # Small but TPU-tile-aligned shapes: head_dim=64 -> 128-wide head blocks,
    # so this exercises the real (8,128)-aligned tiling path.
    B, T, H, N_HEADS = 2, 128, 256, 4

    root = jax.random.PRNGKey(0)
    k_params, k_x, k_mask = jax.random.split(root, 3)

    module = BertSelfAttentionPallas(H, N_HEADS, k_params)

    hidden_states = jax.random.normal(k_x, (B, T, H), jnp.float32)
    # Additive mask: 0 for attend, -10000 for masked positions.
    keep = (jax.random.uniform(k_mask, (B, 1, 1, T)) > 0.2).astype(jnp.float32)
    attention_mask = (1.0 - keep) * -10000.0

    out = module(hidden_states, attention_mask)
    out = jax.block_until_ready(out)

    ref = reference(module, hidden_states, attention_mask)
    assert out.shape == (B, T, H)
    out_f32 = out.astype(jnp.float32)
    max_err = float(jnp.max(jnp.abs(out_f32 - ref)))
    # bf16 inputs/weights/output + approx reciprocal vs. the f32 reference.
    assert jnp.allclose(out_f32, ref, atol=5e-2, rtol=5e-2), \
        f"mismatch vs reference (max abs err {max_err})"

    print("KERNEL_OK")
</pallas_src>

<mosaic_0001>
module attributes {stable_mosaic.version = 11 : i64} {
  func.func @_qkv_proj_kernel(%arg0: i32, %arg1: i32, %arg2: i32, %arg3: memref<1x128x256xbf16, #tpu.memory_space<vmem>>, %arg4: memref<256x768xbf16, #tpu.memory_space<vmem>>, %arg5: memref<1x768xf32, #tpu.memory_space<vmem>>, %arg6: memref<1x128x768xbf16, #tpu.memory_space<vmem>>) attributes {dimension_semantics = [#tpu.dimension_semantics<parallel>, #tpu.dimension_semantics<parallel>, #tpu.dimension_semantics<arbitrary>], iteration_bounds = array<i64: 2, 1, 1>, scalar_prefetch = 0 : i64, scratch_operands = 0 : i64, tpu.core_type = #tpu.core_type<tc>, window_params = [{transform_indices = @transform_0, window_bounds = array<i64: 1, 128, 256>}, {transform_indices = @transform_1, window_bounds = array<i64: 256, 768>}, {transform_indices = @transform_2, window_bounds = array<i64: 1, 768>}, {transform_indices = @transform_3, window_bounds = array<i64: 1, 128, 768>}]} {
    %c0 = arith.constant 0 : index
    %c0_0 = arith.constant 0 : index
    %c0_1 = arith.constant 0 : index
    %0 = vector.load %arg3[%c0, %c0_0, %c0_1] : memref<1x128x256xbf16, #tpu.memory_space<vmem>>, vector<1x128x256xbf16>
    %1 = vector.shape_cast %0 : vector<1x128x256xbf16> to vector<128x256xbf16>
    %c0_2 = arith.constant 0 : index
    %c0_3 = arith.constant 0 : index
    %2 = vector.load %arg4[%c0_2, %c0_3] : memref<256x768xbf16, #tpu.memory_space<vmem>>, vector<256x768xbf16>
    %cst = arith.constant dense<0.000000e+00> : vector<128x768xf32>
    %3 = tpu.matmul %1, %2, %cst {dimension_numbers = #tpu.dot_dimension_numbers<[1], [0], [0], [1], [0, 0, 1, 1], [], []>} : vector<128x256xbf16>, vector<256x768xbf16>, vector<128x768xf32> -> vector<128x768xf32>
    %c0_4 = arith.constant 0 : index
    %c0_5 = arith.constant 0 : index
    %4 = vector.load %arg5[%c0_4, %c0_5] : memref<1x768xf32, #tpu.memory_space<vmem>>, vector<1x768xf32>
    %5 = vector.broadcast %4 : vector<1x768xf32> to vector<128x768xf32>
    %6 = arith.addf %3, %5 : vector<128x768xf32>
    %7 = arith.truncf %6 : vector<128x768xf32> to vector<128x768xbf16>
    %c0_6 = arith.constant 0 : index
    %c0_7 = arith.constant 0 : index
    %c0_8 = arith.constant 0 : index
    %8 = vector.load %arg6[%c0_6, %c0_7, %c0_8] : memref<1x128x768xbf16, #tpu.memory_space<vmem>>, vector<1x128x768xbf16>
    %9 = vector.shape_cast %8 : vector<1x128x768xbf16> to vector<128x768xbf16>
    %10 = vector.shape_cast %7 : vector<128x768xbf16> to vector<1x128x768xbf16>
    tpu.vector_store %arg6[%c0_6, %c0_7, %c0_8], %10 {strides = array<i32>} : memref<1x128x768xbf16, #tpu.memory_space<vmem>>, vector<1x128x768xbf16>,
    return
  }
  func.func @transform_0(%arg0: i32, %arg1: i32, %arg2: i32) -> (i32, i32, i32) {
    %c0_i32 = arith.constant 0 : i32
    %c0_i32_0 = arith.constant 0 : i32
    return %arg0, %arg1, %c0_i32 : i32, i32, i32
  }
  func.func @transform_1(%arg0: i32, %arg1: i32, %arg2: i32) -> (i32, i32) {
    %c0_i32 = arith.constant 0 : i32
    %c0_i32_0 = arith.constant 0 : i32
    return %c0_i32, %arg2 : i32, i32
  }
  func.func @transform_2(%arg0: i32, %arg1: i32, %arg2: i32) -> (i32, i32) {
    %c0_i32 = arith.constant 0 : i32
    %c0_i32_0 = arith.constant 0 : i32
    return %c0_i32, %arg2 : i32, i32
  }
  func.func @transform_3(%arg0: i32, %arg1: i32, %arg2: i32) -> (i32, i32, i32) {
    %c0_i32 = arith.constant 0 : i32
    return %arg0, %arg1, %arg2 : i32, i32, i32
  }
}

</mosaic_0001>

<bundles_post_ra>
// kernel: tpu_custom_call.1
= control target key start
LH: loop header
LB: loop body
LE: loop exit
PB: predicated region body
PF: predicated region fallthrough
CT: control target
= control target key end

     0   :  { %8 = vsyncpa [#allocation3], 0  ;;  %s2912_s0 = inlined_call_operand.hbm [shape: bf16[2,128,256], index: 0, kind: input, shape index: {}]   ;;  %s2913_s1 = inlined_call_operand.hbm [shape: bf16[256,768], index: 1, kind: input, shape index: {}]   ;;  %s2914_s2 = inlined_call_operand.vmem [shape: f32[1,768], index: 2, kind: input, shape index: {}]   ;;  %s2915_s3 = inlined_call_operand.hbm [shape: bf16[2,128,768], index: 3, kind: output, shape index: {}]  }
   0x1   :  { %10 = vsyncpa [#allocation3 + $0x1], 0 }
   0x2   :  { %11 = vsyncpa [#allocation6], 0 }
   0x3   :  { %12 = vsyncpa [#allocation4], 0 }
   0x4   :  { %14 = vsyncpa [#allocation4 + $0x1], 0  ;;  %s2457_s12 = smov 0   ;;  %s2459_s13 = smov 0  }
   0x5   :  { %s2461_s14 = smov 0   ;;  %s2463_s15 = smov 0  }
   0x6   :  { %s2465_s16 = smov 0   ;;  %s2467_s17 = smov 0  }
   0x7 LB: > { %s1777_s18 = sadd.s32 4294967295, %s2426_s17   ;;  %s1778_s19 = sadd.s32 4294967294, %s2426_s17   ;;  %s2426_s17 = sphi %s2467_s17, %s20_s17   ;;  %s2422_s16 = sphi %s2465_s16, %s2939_s16   ;;  %s2418_s15 = sphi %s2463_s15, %s2938_s15   ;;  %s2414_s14 = sphi %s2461_s14, %s2937_s14   ;;  %s2410_s13 = sphi %s2459_s13, %s2936_s13   ;;  %s2406_s12 = sphi %s2457_s12, %s2935_s12  }
   0x8   : > { %p61_p0 = scmp.ne.s32.totalorder %s2410_s13, %s2406_s12  ;;  %p2491_p1 = scmp.eq.s32.totalorder %s1777_s18, 0 }
   0x9   : > { %p2495_p2 = scmp.eq.s32.totalorder %s1777_s18, 1  ;;  %p147_p3 = scmp.eq.s32.totalorder %s1778_s19, 1 }
   0xa   : > { %s2920_s20 = scalar_select %p2491_p1, 1, 0 }
   0xb   : > { %s2921_s21 = scalar_select %p2495_p2, 1, 0 }
   0xc   : > { %p2501_p4 = por %p2491_p1, %p61_p0  ;;  %p1779_p5 = scmp.ge.s32.totalorder %s2426_s17, 1 }
   0xd   : > { %p2506_p6 = por %p147_p3, %p61_p0  ;;  %p154_p7 = scmp.lt.s32.totalorder %s2426_s17, 3 }
   0xe   : > { %s2922_s22 = scalar_select %p2501_p4, 1, 0 }
   0xf   : > { %s2923_s23 = scalar_select %p2506_p6, 1, 0 }
  0x10   : > { %p2511_p8 = pnand %p1779_p5, %p154_p7  ;;  %s2428_s25 = smov [#allocation5]  }
  0x11   : > { %s169_s26 = sshll.u32 %s2428_s25, 4  ;;  %s39_s28 = sadd.s32 1, %s2422_s16  ;;  %s170_s26 = int_to_ptr.vmem [resolvable:$true] %s169_s26 }
  0x12   : > { %s2924_s24 = scalar_select %p2511_p8, 1, 0 }
  0x13   : > { %p2043_p9 = pneg %p2511_p8  ;;  %s2282_s4 = scalar_lea.hbm %s2913_s1, 12288 }
  0x14   : > { %p2283_p12 = scmp.ne.s32.totalorder %s2913_s1, %s2282_s4  ;;  %p2289_p5 = scmp.lt.u32.totalorder %s2282_s4, %s2913_s1 }
  0x15   : > { %p2520_p11 = pnand %p2043_p9, %p2491_p1 }
  0x17   : > { %p2284_p13 = pneg %p2520_p11 }
  0x19   : > { %p2285_p0 = pnand %p2284_p13, %p2283_p12 }
  0x1b   : > { %p2286_p3 = pneg %p2285_p0 }
  0x1d   : > { %p2291_p7 = pnand %p2289_p5, %p2286_p3 }
  0x1f   : > { %2294 = shalt.err (!%p2291_p7)
}
  0x20   : > { %s2295_s9 = scalar_lea.vmem %s170_s26, 12288  ;;  %p2303_p1 = scmp.lt.s32.totalorder %s170_s26, %s170_s26 }
  0x21   : > { %p2296_p9 = scmp.ne.s32.totalorder %s170_s26, %s2295_s9  ;;  %p2304_p4 = scmp.lt.s32.totalorder %s2295_s9, %s2295_s9 }
  0x23   : > { %p2298_p10 = pnand %p2296_p9, %p2284_p13  ;;  %p2305_p8 = por %p2304_p4, %p2303_p1 }
  0x25   : > { %p2299_p6 = pneg %p2298_p10 }
  0x27   : > { %p2306_p2 = pnand %p2305_p8, %p2299_p6 }
  0x29   : > { %2309 = shalt.err (!%p2306_p2)
}
  0x2a   : > { %s2429_s10 = smov 384   ;;  %s2430_s11 = smov 24  }
  0x2b   : > { %2046 = dma.hbm_to_vmem [thread:$0]  (!%p2520_p11), %s2913_s1, 12288, %s170_s26, [#allocation6], %s2429_s10, %s2429_s10, %s2430_s11  }
  0x2c   : > { %p41_p1 = scmp.ge.s32.totalorder %s39_s28, 2  ;;  %s48_s25 = sadd.s32 1, %s2414_s14 }
  0x2d   : > { %p55_p2 = scmp.ne.s32.totalorder %s2414_s14, %s2410_s13  ;;  %p56_p4 = scmp.eq.s32.totalorder %s2426_s17, 0 }
  0x2e   : > { %s2941_s28 = smov (%p41_p1, %s39_s28), 0  ;;  %p2927_p8 = scmp.ne.s32.totalorder %s2921_s21, 0 }
  0x2f   : > { %p2547_p6 = por %p56_p4, %p55_p2  ;;  %s43_s27 = ssub.s32 %s2422_s16, %s2941_s28 }
  0x30   : > { %p2553_p10 = por %p2927_p8, %p55_p2  ;;  %p2056_p12 = scmp.lt.s32.totalorder %s2426_s17, 2 }
  0x31   : > { %p46_p11 = scmp.eq.s32.totalorder %s43_s27, 0  ;;  %s191_s26 = sand.u32 1, %s2414_s14  }
  0x32   : > { %s1783_s4 = sshll.u32 %s191_s26, 7  ;;  %s1952_s6 = sshll.u32 %s2422_s16, 11 }
  0x33   : > { %s2562_s5 = scalar_select %p46_p11, %s2414_s14, %s48_s25  }
  0x34   : > { %s2568_s9 = scalar_lea.hbm %s2912_s0, %s1952_s6  ;;  %s195_s21 = scalar_lea.vmem [#allocation2], %s1783_s4 }
  0x35   : > { %s205_s10 = sshll.u32 %s195_s21, 4  ;;  %p2574_p13 = pnand %p2056_p12, %p2547_p6  ;;  %s2570_s10 = int_to_ptr.vmem [resolvable:$true] %s205_s10 }
  0x36   : > { %s2578_s18 = scalar_lea.sflag [#allocation3], %s191_s26  ;;  %s2310_s19 = scalar_lea.hbm %s2568_s9, 2048 }
  0x37   : > { %p2311_p0 = scmp.ne.s32.totalorder %s2568_s9, %s2310_s19  ;;  %p2312_p3 = pneg %p2574_p13 }
  0x38   : > { %s2315_s29 = scalar_lea.hbm %s2912_s0, 4096  ;;  %p2316_p9 = scmp.lt.u32.totalorder %s2568_s9, %s2912_s0 }
  0x39   : > { %p2313_p5 = pnand %p2312_p3, %p2311_p0  ;;  %p2317_p1 = scmp.lt.u32.totalorder %s2315_s29, %s2310_s19 }
  0x3a   : > { %p2319_p4 = scmp.lt.u32.totalorder %s2310_s19, %s2568_s9 }
  0x3b   : > { %p2314_p7 = pneg %p2313_p5  ;;  %p2318_p2 = por %p2317_p1, %p2316_p9 }
  0x3d   : > { %p2320_p6 = por %p2319_p4, %p2318_p2 }
  0x3f   : > { %p2321_p8 = pnand %p2320_p6, %p2314_p7 }
  0x41   : > { %2324 = shalt.err (!%p2321_p8)
}
  0x42   : > { %s2325_s26 = scalar_lea.vmem %s2570_s10, 2048  ;;  %s2431_s7 = smov [#allocation2]  }
  0x43   : > { %p2326_p12 = scmp.ne.s32.totalorder %s2570_s10, %s2325_s26  ;;  %s2330_s8 = sshll.u32 %s2431_s7, 4  ;;  %s2331_s8 = int_to_ptr.vmem [resolvable:$false] %s2330_s8 }
  0x44   : > { %s2332_s21 = scalar_lea.vmem %s2331_s8, 4096  ;;  %p2333_p5 = scmp.lt.s32.totalorder %s2570_s10, %s2331_s8 }
  0x45   : > { %p2328_p11 = pnand %p2326_p12, %p2312_p3  ;;  %p2334_p9 = scmp.lt.s32.totalorder %s2332_s21, %s2325_s26 }
  0x47   : > { %p2329_p0 = pneg %p2328_p11  ;;  %p2335_p1 = por %p2334_p9, %p2333_p5 }
  0x49   : > { %p2336_p2 = pnand %p2335_p1, %p2329_p0 }
  0x4b   : > { %2339 = shalt.err (!%p2336_p2)
}
  0x4c   : > { %s2432_s19 = smov 128   ;;  %s2433_s25 = smov 8  }
  0x4d   : > { %2050 = dma.hbm_to_vmem [thread:$0]  (!%p2574_p13), %s2568_s9, 2048, %s2570_s10, %s2578_s18, %s2432_s19, %s2432_s19, %s2433_s25  }
  0x4e   : > { %p2930_p3 = scmp.ne.s32.totalorder %s2924_s24, 0 }
  0x4f   : > { %s2609_s27 = sand.u32 (!%p2930_p3), 1, %s2410_s13   ;;  %p2931_p7 = scmp.ne.s32.totalorder (!%p2930_p3), %s2922_s22, 0 }
  0x50   : > { %217 = sbr.rel (%p2930_p3) target bundleno = 479 (0x1df), region = 32  ;;  %s1787_s29 = sshll.u32 (!%p2930_p3), %s2609_s27, 7 }
  0x51   : > { %s220_s4 = scalar_lea.sflag (!%p2930_p3), [#allocation3], %s2609_s27  ;;  %s2613_s6 = scalar_lea.vmem (!%p2930_p3), [#allocation2], %s1787_s29 }
  0x57   : > { %2393 = dma.done.wait (%p2931_p7), %s220_s4, 2048  }
  0x58   : > { %2395 = vsyncadd (%p2931_p7), %s220_s4, 4294965248  ;;  %p2932_p13 = scmp.ne.s32.totalorder %s2920_s20, 0 }
  0x5a   : > { %2397 = dma.done.wait (%p2932_p13), [#allocation6], 12288  }
  0x5b   : > { %2399 = vsyncadd (%p2932_p13), [#allocation6], 4294955008  ;;  %v2114_v0 = vld [vmem:[#allocation5 + $0x4] ss:$24 sps:$4 sm:$0xff]   ;;  %v2118_v2 = vld [vmem:[#allocation5] ss:$24 sps:$4 sm:$0xff]  }
  0x5c   : > { %v2116_v1 = vld [vmem:[#allocation5 + $0xc] ss:$24 sps:$4 sm:$0xff]   ;;  %967 = vmatprep.subr.bf16.mxu0 %v2114_v0  ;;  %v2119_v3 = vld [vmem:[#allocation5 + $0x8] ss:$24 sps:$4 sm:$0xff]   ;;  %v2122_v5 = vld [vmem:[#allocation5 + $0x3c] ss:$24 sps:$4 sm:$0xff]  }
  0x5d   : > { %1080 = vmatprep.subr.bf16.mxu1 %v2116_v1  ;;  %v2120_v4 = vld [vmem:[#allocation5 + $0x34] ss:$24 sps:$4 sm:$0xff]   ;;  %968 = vmatpush1.bf16.msra.mxu0 %v2118_v2  ;;  %v2124_v6 = vld [vmem:[#allocation5 + $0x30] ss:$24 sps:$4 sm:$0xff]   ;;  %v2126_v8 = vld [vmem:[#allocation5 + $0x64] ss:$24 sps:$4 sm:$0xff]  }
  0x5e   : > { %1081 = vmatpush1.bf16.msra.mxu1 %v2119_v3  ;;  %969 = vmatprep.subr.bf16.mxu0 %v2120_v4  ;;  %v2125_v7 = vld [vmem:[#allocation5 + $0x38] ss:$24 sps:$4 sm:$0xff]   ;;  %v2128_v9 = vld [vmem:[#allocation5 + $0x6c] ss:$24 sps:$4 sm:$0xff]   ;;  %v2131_v11 = vld [vmem:[#allocation5 + $0x68] ss:$24 sps:$4 sm:$0xff]  }
  0x5f   : > { %1082 = vmatprep.subr.bf16.mxu1 %v2122_v5  ;;  %v2130_v10 = vld [vmem:[#allocation5 + $0x60] ss:$24 sps:$4 sm:$0xff]   ;;  %v2132_v12 = vld [vmem:[#allocation5 + $0x94] ss:$24 sps:$4 sm:$0xff]   ;;  %v2136_v14 = vld [vmem:[#allocation5 + $0x90] ss:$24 sps:$4 sm:$0xff]  }
  0x60   : > { %v2134_v13 = vld [vmem:[#allocation5 + $0x9c] ss:$24 sps:$4 sm:$0xff]   ;;  %v2137_v15 = vld [vmem:[#allocation5 + $0x98] ss:$24 sps:$4 sm:$0xff]   ;;  %v2140_v17 = vld [vmem:[#allocation5 + $0xcc] ss:$24 sps:$4 sm:$0xff]  }
  0x61   : > { %970 = vmatpush1.bf16.msra.mxu0 %v2124_v6  ;;  %v2138_v16 = vld [vmem:[#allocation5 + $0xc4] ss:$24 sps:$4 sm:$0xff]   ;;  %v2142_v18 = vld [vmem:[#allocation5 + $0xc0] ss:$24 sps:$4 sm:$0xff]   ;;  %v2144_v20 = vld [vmem:[#allocation5 + $0xf4] ss:$24 sps:$4 sm:$0xff]  }
  0x62   : > { %1083 = vmatpush1.bf16.msra.mxu1 %v2125_v7  ;;  %971 = vmatprep.subr.bf16.mxu0 %v2126_v8  ;;  %v2143_v19 = vld [vmem:[#allocation5 + $0xc8] ss:$24 sps:$4 sm:$0xff]   ;;  %v2146_v21 = vld [vmem:[#allocation5 + $0xfc] ss:$24 sps:$4 sm:$0xff]   ;;  %v2149_v23 = vld [vmem:[#allocation5 + $0xf8] ss:$24 sps:$4 sm:$0xff]  }
  0x63   : > { %1084 = vmatprep.subr.bf16.mxu1 %v2128_v9  ;;  %v2148_v22 = vld [vmem:[#allocation5 + $0xf0] ss:$24 sps:$4 sm:$0xff]   ;;  %v2150_v24 = vld [vmem:[#allocation5 + $0x124] ss:$24 sps:$4 sm:$0xff]   ;;  %v2154_v26 = vld [vmem:[#allocation5 + $0x120] ss:$24 sps:$4 sm:$0xff]  }
  0x64   : > { %v2152_v25 = vld [vmem:[#allocation5 + $0x12c] ss:$24 sps:$4 sm:$0xff]   ;;  %v2155_v27 = vld [vmem:[#allocation5 + $0x128] ss:$24 sps:$4 sm:$0xff]   ;;  %v2158_v29 = vld [vmem:[#allocation5 + $0x15c] ss:$24 sps:$4 sm:$0xff]  }
  0x65   : > { %972 = vmatpush1.bf16.msra.mxu0 %v2130_v10  ;;  %v2156_v28 = vld [vmem:[#allocation5 + $0x154] ss:$24 sps:$4 sm:$0xff]   ;;  %v2160_v30 = vld [vmem:[#allocation5 + $0x150] ss:$24 sps:$4 sm:$0xff]   ;;  %v2162_v32 = vld [vmem:[#allocation5 + $0x184] ss:$24 sps:$4 sm:$0xff]  }
  0x66   : > { %1085 = vmatpush1.bf16.msra.mxu1 %v2131_v11  ;;  %973 = vmatprep.subr.bf16.mxu0 %v2132_v12  ;;  %v2161_v31 = vld [vmem:[#allocation5 + $0x158] ss:$24 sps:$4 sm:$0xff]   ;;  %v2164_v33 = vld [vmem:[#allocation5 + $0x18c] ss:$24 sps:$4 sm:$0xff]   ;;  %v2167_v35 = vld [vmem:[#allocation5 + $0x188] ss:$24 sps:$4 sm:$0xff]  }
  0x67   : > { %1086 = vmatprep.subr.bf16.mxu1 %v2134_v13  ;;  %v2166_v34 = vld [vmem:[#allocation5 + $0x180] ss:$24 sps:$4 sm:$0xff]   ;;  %v2168_v36 = vld [vmem:[#allocation5 + $0x1b4] ss:$24 sps:$4 sm:$0xff]   ;;  %v2172_v38 = vld [vmem:[#allocation5 + $0x1b0] ss:$24 sps:$4 sm:$0xff]  }
  0x68   : > { %v2170_v37 = vld [vmem:[#allocation5 + $0x1bc] ss:$24 sps:$4 sm:$0xff]   ;;  %v2173_v39 = vld [vmem:[#allocation5 + $0x1b8] ss:$24 sps:$4 sm:$0xff]   ;;  %v2176_v41 = vld [vmem:[#allocation5 + $0x1ec] ss:$24 sps:$4 sm:$0xff]  }
  0x69   : > { %974 = vmatpush1.bf16.msra.mxu0 %v2136_v14  ;;  %v2174_v40 = vld [vmem:[#allocation5 + $0x1e4] ss:$24 sps:$4 sm:$0xff]   ;;  %v2178_v42 = vld [vmem:[#allocation5 + $0x1e0] ss:$24 sps:$4 sm:$0xff]   ;;  %v2180_v44 = vld [vmem:[#allocation5 + $0x214] ss:$24 sps:$4 sm:$0xff]  }
  0x6a   : > { %1087 = vmatpush1.bf16.msra.mxu1 %v2137_v15  ;;  %975 = vmatprep.subr.bf16.mxu0 %v2138_v16  ;;  %v2179_v43 = vld [vmem:[#allocation5 + $0x1e8] ss:$24 sps:$4 sm:$0xff]   ;;  %v2182_v45 = vld [vmem:[#allocation5 + $0x21c] ss:$24 sps:$4 sm:$0xff]   ;;  %v2185_v47 = vld [vmem:[#allocation5 + $0x218] ss:$24 sps:$4 sm:$0xff]  }
  0x6b   : > { %1088 = vmatprep.subr.bf16.mxu1 %v2140_v17  ;;  %v2184_v46 = vld [vmem:[#allocation5 + $0x210] ss:$24 sps:$4 sm:$0xff]   ;;  %v2624_v48 = vld [vmem:[%s2613_s6 + $0x4] ss:$8 sps:$4 sm:$0xff]   ;;  %v2190_v51 = vld [vmem:[#allocation5 + $0x240] ss:$24 sps:$4 sm:$0xff]  }
  0x6c   : > { %v2186_v49 = vld [vmem:[#allocation5 + $0x244] ss:$24 sps:$4 sm:$0xff]   ;;  %999 = vmatprep.mubr.bf16.mxu0 %v2624_v48  ;;  %1112 = vmatprep.mubr.bf16.mxu1 %v2624_v48  ;;  %v2191_v52 = vld [vmem:[#allocation5 + $0x248] ss:$24 sps:$4 sm:$0xff]   ;;  %v2192_v53 = vld [vmem:[#allocation5 + $0x274] ss:$24 sps:$4 sm:$0xff]  }
  0x6d   : > { %976 = vmatpush1.bf16.msra.mxu0 %v2142_v18  ;;  %v2188_v50 = vld [vmem:[#allocation5 + $0x24c] ss:$24 sps:$4 sm:$0xff]   ;;  %v2194_v54 = vld [vmem:[#allocation5 + $0x27c] ss:$24 sps:$4 sm:$0xff]   ;;  %v2196_v55 = vld [vmem:[#allocation5 + $0x270] ss:$24 sps:$4 sm:$0xff]  }
  0x6e   : > { %1089 = vmatpush1.bf16.msra.mxu1 %v2143_v19  ;;  %977 = vmatprep.subr.bf16.mxu0 %v2144_v20  ;;  %v2197_v56 = vld [vmem:[#allocation5 + $0x278] ss:$24 sps:$4 sm:$0xff]   ;;  %v2198_v57 = vld [vmem:[#allocation5 + $0x2a4] ss:$24 sps:$4 sm:$0xff]   ;;  %v2203_v60 = vld [vmem:[#allocation5 + $0x2a8] ss:$24 sps:$4 sm:$0xff]  }
  0x6f   : > { %1090 = vmatprep.subr.bf16.mxu1 %v2146_v21  ;;  %v2200_v58 = vld [vmem:[#allocation5 + $0x2ac] ss:$24 sps:$4 sm:$0xff]   ;;  %v2202_v59 = vld [vmem:[#allocation5 + $0x2a0] ss:$24 sps:$4 sm:$0xff]   ;;  %v2206_v62 = vld [vmem:[#allocation5 + $0x2dc] ss:$24 sps:$4 sm:$0xff]  }
  0x70   : > { %v2204_v61 = vld [vmem:[#allocation5 + $0x2d4] ss:$24 sps:$4 sm:$0xff]   ;;  %v2208_v63 = vld [vmem:[#allocation5 + $0x2d0] ss:$24 sps:$4 sm:$0xff]   ;;  %v2218_v4 = vld [vmem:[#allocation5 + $0x44] ss:$24 sps:$4 sm:$0xff]  }
  0x71   : > { %978 = vmatpush1.bf16.msra.mxu0 %v2148_v22  ;;  %v2209_v0 = vld [vmem:[#allocation5 + $0x2d8] ss:$24 sps:$4 sm:$0xff]   ;;  %v2215_v1 = vld [vmem:[#allocation5 + $0x14] ss:$24 sps:$4 sm:$0xff]   ;;  %v2629_v2 = vld [vmem:[%s2613_s6] ss:$8 sps:$4 sm:$0xff]  }
  0x72   : > { %1091 = vmatpush1.bf16.msra.mxu1 %v2149_v23  ;;  %979 = vmatprep.subr.bf16.mxu0 %v2150_v24  ;;  %v2213_v3 = vld [vmem:[#allocation5 + $0x10] ss:$24 sps:$4 sm:$0xff]   ;;  %v2632_v5 = vld [vmem:[%s2613_s6 + $0x14] ss:$8 sps:$4 sm:$0xff]   ;;  %v2216_v6 = vld [vmem:[#allocation5 + $0x40] ss:$24 sps:$4 sm:$0xff]  }
  0x73   : > { %1092 = vmatprep.subr.bf16.mxu1 %v2152_v25  ;;  %v2224_v7 = vld [vmem:[#allocation5 + $0x74] ss:$24 sps:$4 sm:$0xff]   ;;  %v2639_v8 = vld [vmem:[%s2613_s6 + $0x10] ss:$8 sps:$4 sm:$0xff]   ;;  %v2227_v10 = vld [vmem:[#allocation5 + $0xa4] ss:$24 sps:$4 sm:$0xff]  }
  0x74   : > { %v2222_v9 = vld [vmem:[#allocation5 + $0x70] ss:$24 sps:$4 sm:$0xff]   ;;  %v2642_v11 = vld [vmem:[%s2613_s6 + $0x24] ss:$8 sps:$4 sm:$0xff]   ;;  %v2225_v12 = vld [vmem:[#allocation5 + $0xa0] ss:$24 sps:$4 sm:$0xff]  }
  0x75   : > { %980 = vmatpush1.bf16.msra.mxu0 %v2154_v26  ;;  %v2233_v13 = vld [vmem:[#allocation5 + $0xd4] ss:$24 sps:$4 sm:$0xff]   ;;  %v2649_v14 = vld [vmem:[%s2613_s6 + $0x20] ss:$8 sps:$4 sm:$0xff]   ;;  %v2236_v16 = vld [vmem:[#allocation5 + $0x104] ss:$24 sps:$4 sm:$0xff]  }
  0x76   : > { %1093 = vmatpush1.bf16.msra.mxu1 %v2155_v27  ;;  %981 = vmatprep.subr.bf16.mxu0 %v2156_v28  ;;  %v2231_v15 = vld [vmem:[#allocation5 + $0xd0] ss:$24 sps:$4 sm:$0xff]   ;;  %v2652_v17 = vld [vmem:[%s2613_s6 + $0x34] ss:$8 sps:$4 sm:$0xff]   ;;  %v2234_v18 = vld [vmem:[#allocation5 + $0x100] ss:$24 sps:$4 sm:$0xff]  }
  0x77   : > { %1094 = vmatprep.subr.bf16.mxu1 %v2158_v29  ;;  %v2242_v19 = vld [vmem:[#allocation5 + $0x134] ss:$24 sps:$4 sm:$0xff]   ;;  %v2659_v20 = vld [vmem:[%s2613_s6 + $0x30] ss:$8 sps:$4 sm:$0xff]   ;;  %v2245_v22 = vld [vmem:[#allocation5 + $0x164] ss:$24 sps:$4 sm:$0xff]  }
  0x78   : > { %v2240_v21 = vld [vmem:[#allocation5 + $0x130] ss:$24 sps:$4 sm:$0xff]   ;;  %v2662_v23 = vld [vmem:[%s2613_s6 + $0x44] ss:$8 sps:$4 sm:$0xff]   ;;  %v2243_v24 = vld [vmem:[#allocation5 + $0x160] ss:$24 sps:$4 sm:$0xff]  }
  0x79   : > { %982 = vmatpush1.bf16.msra.mxu0 %v2160_v30  ;;  %v2251_v25 = vld [vmem:[#allocation5 + $0x194] ss:$24 sps:$4 sm:$0xff]   ;;  %v2669_v26 = vld [vmem:[%s2613_s6 + $0x40] ss:$8 sps:$4 sm:$0xff]   ;;  %v2254_v28 = vld [vmem:[#allocation5 + $0x1c4] ss:$24 sps:$4 sm:$0xff]  }
  0x7a   : > { %1095 = vmatpush1.bf16.msra.mxu1 %v2161_v31  ;;  %983 = vmatprep.subr.bf16.mxu0 %v2162_v32  ;;  %v2249_v27 = vld [vmem:[#allocation5 + $0x190] ss:$24 sps:$4 sm:$0xff]   ;;  %v2672_v29 = vld [vmem:[%s2613_s6 + $0x54] ss:$8 sps:$4 sm:$0xff]   ;;  %v2252_v30 = vld [vmem:[#allocation5 + $0x1c0] ss:$24 sps:$4 sm:$0xff]  }
  0x7b   : > { %1096 = vmatprep.subr.bf16.mxu1 %v2164_v33  ;;  %v2260_v31 = vld [vmem:[#allocation5 + $0x1f4] ss:$24 sps:$4 sm:$0xff]   ;;  %v2257_v32 = vld [vmem:[%s2613_s6 + $0x50] ss:$8 sps:$4 sm:$0xff]   ;;  %s2033_s24 = smul.u32 384, %s2609_s27  ;;  %s1643_s7 = scalar_lea.sflag [#allocation4], %s2609_s27 }
  0x7c   : > { %v2258_v33 = vld [vmem:[#allocation5 + $0x1f0] ss:$24 sps:$4 sm:$0xff]   ;;  %s2034_s10 = smul.u32 6144, %s2418_s15  ;;  %s2434_s21 = smov [#allocation7]  }
  0x7d   : > { %984 = vmatpush1.bf16.msra.mxu0 %v2166_v34  ;;  %v2263_v34 = vld [vmem:[#allocation5 + $0x224] ss:$24 sps:$4 sm:$0xff]   ;;  %s2718_s9 = scalar_lea.vmem [#allocation7], %s2033_s24  ;;  %s2344_s19 = sshll.u32 %s2434_s21, 4  ;;  %s2345_s19 = int_to_ptr.vmem [resolvable:$false] %s2344_s19 }
  0x7e   : > { %1097 = vmatpush1.bf16.msra.mxu1 %v2167_v35  ;;  %985 = vmatprep.subr.bf16.mxu0 %v2168_v36  ;;  %v2264_v35 = vld [vmem:[%s2613_s6 + $0x64] ss:$8 sps:$4 sm:$0xff]   ;;  %v2261_v36 = vld [vmem:[#allocation5 + $0x220] ss:$24 sps:$4 sm:$0xff]   ;;  %s1661_s11 = sshll.u32 %s2718_s9, 4  ;;  %s2857_s26 = scalar_lea.hbm %s2915_s3, %s2034_s10  ;;  %s2859_s11 = int_to_ptr.vmem [resolvable:$true] %s1661_s11 }
  0x7f   : > { %1098 = vmatprep.subr.bf16.mxu1 %v2170_v37  ;;  %v2269_v37 = vld [vmem:[#allocation5 + $0x254] ss:$24 sps:$4 sm:$0xff]   ;;  %s2340_s8 = scalar_lea.vmem %s2859_s11, 6144  ;;  %s2346_s25 = scalar_lea.vmem %s2345_s19, 12288 }
  0x80   : > { %p2341_p4 = scmp.ne.s32.totalorder %s2859_s11, %s2340_s8  ;;  %p2347_p12 = scmp.lt.s32.totalorder %s2859_s11, %s2345_s19 }
  0x81   : > { %986 = vmatpush1.bf16.msra.mxu0 %v2172_v38  ;;  %v2266_v38 = vld [vmem:[%s2613_s6 + $0x60] ss:$8 sps:$4 sm:$0xff]   ;;  %p2348_p11 = scmp.lt.s32.totalorder %s2346_s25, %s2340_s8 }
  0x82   : > { %1099 = vmatpush1.bf16.msra.mxu1 %v2173_v39  ;;  %987 = vmatprep.subr.bf16.mxu0 %v2174_v40  ;;  %v2267_v39 = vld [vmem:[#allocation5 + $0x250] ss:$24 sps:$4 sm:$0xff]   ;;  %v2272_v40 = vld [vmem:[#allocation5 + $0x284] ss:$24 sps:$4 sm:$0xff]   ;;  %p2342_p6 = pnand %p2341_p4, %p2553_p10 }
  0x83   : > { %1100 = vmatprep.subr.bf16.mxu1 %v2176_v41  ;;  %v2273_v41 = vld [vmem:[%s2613_s6 + $0x74] ss:$8 sps:$4 sm:$0xff]   ;;  %p2349_p0 = por %p2348_p11, %p2347_p12 }
  0x84   : > { %p2343_p8 = pneg %p2342_p6 }
  0x85   : > { %988 = vmatpush1.bf16.msra.mxu0 %v2178_v42  ;;  %v2270_v42 = vld [vmem:[#allocation5 + $0x280] ss:$24 sps:$4 sm:$0xff]  }
  0x86   : > { %1101 = vmatpush1.bf16.msra.mxu1 %v2179_v43  ;;  %989 = vmatprep.subr.bf16.mxu0 %v2180_v44  ;;  %v2278_v43 = vld [vmem:[#allocation5 + $0x2b4] ss:$24 sps:$4 sm:$0xff]   ;;  %v2275_v44 = vld [vmem:[%s2613_s6 + $0x70] ss:$8 sps:$4 sm:$0xff]   ;;  %p2350_p5 = pnand %p2349_p0, %p2343_p8 }
  0x87   : > { %1102 = vmatprep.subr.bf16.mxu1 %v2182_v45  ;;  %v2276_v45 = vld [vmem:[#allocation5 + $0x2b0] ss:$24 sps:$4 sm:$0xff]  }
  0x89   : > { %990 = vmatpush1.bf16.msra.mxu0 %v2184_v46  ;;  %v2281_v46 = vld [vmem:[#allocation5 + $0x2e4] ss:$24 sps:$4 sm:$0xff]  }
  0x8a   : > { %1103 = vmatpush1.bf16.msra.mxu1 %v2185_v47  ;;  %991 = vmatprep.subr.bf16.mxu0 %v2186_v49  ;;  %v2279_v47 = vld [vmem:[#allocation5 + $0x2e0] ss:$24 sps:$4 sm:$0xff]  }
  0x8b   : > { %1104 = vmatprep.subr.bf16.mxu1 %v2188_v50 }
  0x8d   : > { %992 = vmatpush1.bf16.msra.mxu0 %v2190_v51  ;;  %v375_v51 = vld [vmem:[%s2914_s2] sm:$0x3f] }
  0x8e   : > { %1105 = vmatpush1.bf16.msra.mxu1 %v2191_v52  ;;  %993 = vmatprep.subr.bf16.mxu0 %v2192_v53 }
  0x8f   : > { %1106 = vmatprep.subr.bf16.mxu1 %v2194_v54 }
  0x91   : > { %994 = vmatpush1.bf16.msra.mxu0 %v2196_v55 }
  0x92   : > { %1107 = vmatpush1.bf16.msra.mxu1 %v2197_v56  ;;  %995 = vmatprep.subr.bf16.mxu0 %v2198_v57 }
  0x93   : > { %1108 = vmatprep.subr.bf16.mxu1 %v2200_v58 }
  0x95   : > { %996 = vmatpush1.bf16.msra.mxu0 %v2202_v59 }
  0x96   : > { %1109 = vmatpush1.bf16.msra.mxu1 %v2203_v60  ;;  %997 = vmatprep.subr.bf16.mxu0 %v2204_v61 }
  0x97   : > { %1110 = vmatprep.subr.bf16.mxu1 %v2206_v62 }
  0x99   : > { %998 = vmatpush1.bf16.msra.mxu0 %v2208_v63 }
  0x9a   : > { %1111 = vmatpush1.bf16.msra.mxu1 %v2209_v0  ;;  %1193 = vmatprep.subr.bf16.mxu0 %v2215_v1 }
  0x9b   : > { %2001 = vmatprep.subr.bf16.mxu1 %v2215_v1 }
  0x9c   : > { %1000 = vmatmul.mubr.bf16.vlgmr.msra.gmra.mrb[0].mxu0 %v2629_v2 }
  0x9d   : > { %1113 = vmatmul.mubr.bf16.vlgmr.msra.gmra.mrb[0].mxu1 %v2629_v2  ;;  %1194 = vmatpush1.bf16.msra.mxu0 %v2213_v3 }
  0x9e   : > { %2017 = vmatpush1.bf16.msra.mxu1 %v2213_v3  ;;  %1195 = vmatprep.subr.bf16.mxu0 %v2218_v4 }
  0x9f   : > { %2002 = vmatprep.subr.bf16.mxu1 %v2218_v4  ;;  %1009 = vmatprep.mubr.bf16.mxu0 %v2632_v5 }
  0xa0   : > { %1122 = vmatprep.mubr.bf16.mxu1 %v2632_v5 }
  0xa1   : > { %1196 = vmatpush1.bf16.msra.mxu0 %v2216_v6 }
  0xa2   : > { %2018 = vmatpush1.bf16.msra.mxu1 %v2216_v6  ;;  %1197 = vmatprep.subr.bf16.mxu0 %v2224_v7 }
  0xa3   : > { %2003 = vmatprep.subr.bf16.mxu1 %v2224_v7 }
  0xa4   : > { %1010 = vmatmul.mubr.bf16.gmra.mrb[4].mxu0 %v2639_v8 }
  0xa5   : > { %1123 = vmatmul.mubr.bf16.gmra.mrb[4].mxu1 %v2639_v8  ;;  %1198 = vmatpush1.bf16.msra.mxu0 %v2222_v9 }
  0xa6   : > { %2019 = vmatpush1.bf16.msra.mxu1 %v2222_v9  ;;  %1199 = vmatprep.subr.bf16.mxu0 %v2227_v10 }
  0xa7   : > { %2004 = vmatprep.subr.bf16.mxu1 %v2227_v10  ;;  %1019 = vmatprep.mubr.bf16.mxu0 %v2642_v11 }
  0xa8   : > { %1132 = vmatprep.mubr.bf16.mxu1 %v2642_v11 }
  0xa9   : > { %1200 = vmatpush1.bf16.msra.mxu0 %v2225_v12 }
  0xaa   : > { %2020 = vmatpush1.bf16.msra.mxu1 %v2225_v12  ;;  %1201 = vmatprep.subr.bf16.mxu0 %v2233_v13 }
  0xab   : > { %2005 = vmatprep.subr.bf16.mxu1 %v2233_v13 }
  0xac   : > { %1020 = vmatmul.mubr.bf16.gmra.mrb[8].mxu0 %v2649_v14 }
  0xad   : > { %1133 = vmatmul.mubr.bf16.gmra.mrb[8].mxu1 %v2649_v14  ;;  %1202 = vmatpush1.bf16.msra.mxu0 %v2231_v15 }
  0xae   : > { %2021 = vmatpush1.bf16.msra.mxu1 %v2231_v15  ;;  %1203 = vmatprep.subr.bf16.mxu0 %v2236_v16 }
  0xaf   : > { %2006 = vmatprep.subr.bf16.mxu1 %v2236_v16  ;;  %1029 = vmatprep.mubr.bf16.mxu0 %v2652_v17 }
  0xb0   : > { %1142 = vmatprep.mubr.bf16.mxu1 %v2652_v17 }
  0xb1   : > { %1204 = vmatpush1.bf16.msra.mxu0 %v2234_v18 }
  0xb2   : > { %2022 = vmatpush1.bf16.msra.mxu1 %v2234_v18  ;;  %1205 = vmatprep.subr.bf16.mxu0 %v2242_v19 }
  0xb3   : > { %2007 = vmatprep.subr.bf16.mxu1 %v2242_v19 }
  0xb4   : > { %1030 = vmatmul.mubr.bf16.gmra.mrb[12].mxu0 %v2659_v20 }
  0xb5   : > { %1143 = vmatmul.mubr.bf16.gmra.mrb[12].mxu1 %v2659_v20  ;;  %1206 = vmatpush1.bf16.msra.mxu0 %v2240_v21 }
  0xb6   : > { %2023 = vmatpush1.bf16.msra.mxu1 %v2240_v21  ;;  %1207 = vmatprep.subr.bf16.mxu0 %v2245_v22 }
  0xb7   : > { %2008 = vmatprep.subr.bf16.mxu1 %v2245_v22  ;;  %1039 = vmatprep.mubr.bf16.mxu0 %v2662_v23 }
  0xb8   : > { %1152 = vmatprep.mubr.bf16.mxu1 %v2662_v23 }
  0xb9   : > { %1208 = vmatpush1.bf16.msra.mxu0 %v2243_v24 }
  0xba   : > { %2024 = vmatpush1.bf16.msra.mxu1 %v2243_v24  ;;  %1209 = vmatprep.subr.bf16.mxu0 %v2251_v25 }
  0xbb   : > { %2009 = vmatprep.subr.bf16.mxu1 %v2251_v25 }
  0xbc   : > { %1040 = vmatmul.mubr.bf16.gmra.mrb[16].mxu0 %v2669_v26 }
  0xbd   : > { %1153 = vmatmul.mubr.bf16.gmra.mrb[16].mxu1 %v2669_v26  ;;  %1210 = vmatpush1.bf16.msra.mxu0 %v2249_v27 }
  0xbe   : > { %2025 = vmatpush1.bf16.msra.mxu1 %v2249_v27  ;;  %1211 = vmatprep.subr.bf16.mxu0 %v2254_v28 }
  0xbf   : > { %2010 = vmatprep.subr.bf16.mxu1 %v2254_v28  ;;  %1049 = vmatprep.mubr.bf16.mxu0 %v2672_v29 }
  0xc0   : > { %1162 = vmatprep.mubr.bf16.mxu1 %v2672_v29 }
  0xc1   : > { %1212 = vmatpush1.bf16.msra.mxu0 %v2252_v30 }
  0xc2   : > { %2026 = vmatpush1.bf16.msra.mxu1 %v2252_v30  ;;  %1213 = vmatprep.subr.bf16.mxu0 %v2260_v31 }
  0xc3   : > { %2011 = vmatprep.subr.bf16.mxu1 %v2260_v31 }
  0xc4   : > { %1050 = vmatmul.mubr.bf16.gmra.mrb[20].mxu0 %v2257_v32 }
  0xc5   : > { %1163 = vmatmul.mubr.bf16.gmra.mrb[20].mxu1 %v2257_v32  ;;  %1214 = vmatpush1.bf16.msra.mxu0 %v2258_v33 }
  0xc6   : > { %2027 = vmatpush1.bf16.msra.mxu1 %v2258_v33  ;;  %1215 = vmatprep.subr.bf16.mxu0 %v2263_v34 }
  0xc7   : > { %2012 = vmatprep.subr.bf16.mxu1 %v2263_v34  ;;  %1059 = vmatprep.mubr.bf16.mxu0 %v2264_v35 }
  0xc8   : > { %1172 = vmatprep.mubr.bf16.mxu1 %v2264_v35 }
  0xc9   : > { %1216 = vmatpush1.bf16.msra.mxu0 %v2261_v36 }
  0xca   : > { %2028 = vmatpush1.bf16.msra.mxu1 %v2261_v36  ;;  %1217 = vmatprep.subr.bf16.mxu0 %v2269_v37 }
  0xcb   : > { %2013 = vmatprep.subr.bf16.mxu1 %v2269_v37 }
  0xcc   : > { %1060 = vmatmul.mubr.bf16.gmra.mrb[24].mxu0 %v2266_v38 }
  0xcd   : > { %1173 = vmatmul.mubr.bf16.gmra.mrb[24].mxu1 %v2266_v38  ;;  %1218 = vmatpush1.bf16.msra.mxu0 %v2267_v39 }
  0xce   : > { %2029 = vmatpush1.bf16.msra.mxu1 %v2267_v39  ;;  %1219 = vmatprep.subr.bf16.mxu0 %v2272_v40 }
  0xcf   : > { %2014 = vmatprep.subr.bf16.mxu1 %v2272_v40  ;;  %1069 = vmatprep.mubr.bf16.mxu0 %v2273_v41 }
  0xd0   : > { %1182 = vmatprep.mubr.bf16.mxu1 %v2273_v41 }
  0xd1   : > { %1220 = vmatpush1.bf16.msra.mxu0 %v2270_v42 }
  0xd2   : > { %2030 = vmatpush1.bf16.msra.mxu1 %v2270_v42  ;;  %1221 = vmatprep.subr.bf16.mxu0 %v2278_v43 }
  0xd3   : > { %2015 = vmatprep.subr.bf16.mxu1 %v2278_v43 }
  0xd4   : > { %1070 = vmatmul.mubr.bf16.gmra.mrb[28].mxu0 %v2275_v44 }
  0xd5   : > { %1183 = vmatmul.mubr.bf16.gmra.mrb[28].mxu1 %v2275_v44  ;;  %1222 = vmatpush1.bf16.msra.mxu0 %v2276_v45 }
  0xd6   : > { %2031 = vmatpush1.bf16.msra.mxu1 %v2276_v45  ;;  %1223 = vmatprep.subr.bf16.mxu0 %v2281_v46 }
  0xd7   : > { %2016 = vmatprep.subr.bf16.mxu1 %v2281_v46  ;;  %1225 = vmatprep.mubr.bf16.mxu0 %v2624_v48  ;;  %v377_v48 = vlaneseq }
  0xd8   : > { %1265 = vmatprep.mubr.bf16.mxu1 %v2662_v23 }
  0xd9   : > { %1224 = vmatpush1.bf16.msra.mxu0 %v2279_v47  ;;  %v378_v49 = vshrl.u32 %v377_v48, 7 }
  0xda   : > { %2032 = vmatpush1.bf16.msra.mxu1 %v2279_v47 }
  0xdb   : > { %v395_v50 = vsub.s32 4, %v378_v49  ;;  %v399_v52 = vsub.s32 5, %v378_v49  ;;  %v379_v55 = vsub.s32 0, %v378_v49  ;;  %v387_v56 = vsub.s32 2, %v378_v49 }
  0xdc   : > { %1226 = vmatmul.mubr.bf16.vlgmr.msra.gmra.mrb[32].mxu0 %v2629_v2  ;;  %v383_v57 = vsub.s32 1, %v378_v49  ;;  %v391_v58 = vsub.s32 3, %v378_v49 }
  0xdd   : > { %1266 = vmatmul.mubr.bf16.vlgmr.msra.gmra.mrb[32].mxu1 %v2669_v26  ;;  %1235 = vmatprep.mubr.bf16.mxu0 %v2632_v5  ;;  %v2697_v53 = vrot.slane %v375_v51, %v395_v50  ;;  %v2699_v54 = vrot.slane %v375_v51, %v399_v52  ;;  %v2701_v59 = vrot.slane %v375_v51, %v379_v55 }
  0xde   : > { %1275 = vmatprep.mubr.bf16.mxu1 %v2672_v29  ;;  %v2703_v60 = vrot.slane %v375_v51, %v387_v56  ;;  %v2705_v61 = vrot.slane %v375_v51, %v383_v57  ;;  %v2707_v62 = vrot.slane %v375_v51, %v391_v58 }
  0xe4   : > { %1236 = vmatmul.mubr.bf16.gmra.mrb[36].mxu0 %v2639_v8 }
  0xe5   : > { %1276 = vmatmul.mubr.bf16.gmra.mrb[36].mxu1 %v2257_v32  ;;  %1245 = vmatprep.mubr.bf16.mxu0 %v2642_v11 }
  0xe6   : > { %1285 = vmatprep.mubr.bf16.mxu1 %v2264_v35 }
  0xec   : > { %1246 = vmatmul.mubr.bf16.gmra.mrb[40].mxu0 %v2649_v14 }
  0xed   : > { %1286 = vmatmul.mubr.bf16.gmra.mrb[40].mxu1 %v2266_v38  ;;  %1255 = vmatprep.mubr.bf16.mxu0 %v2652_v17 }
  0xee   : > { %1295 = vmatprep.mubr.bf16.mxu1 %v2273_v41 }
  0xf4   : > { %1256 = vmatmul.mubr.bf16.gmra.mrb[44].mxu0 %v2659_v20 }
  0xf5   : > { %1296 = vmatmul.mubr.bf16.gmra.mrb[44].mxu1 %v2275_v44 }
 0x16f   : > { %v1001_v63 = vpop.f32.mrb[0].mxu0 }
 0x170   : > { %v1114_v0 = vpop.f32.mrb[0].mxu1  ;;  %v1002_v1 = vadd.f32 %v1001_v63, %v2701_v59  ;;  %v1003_v3 = vpop.f32.mrb[1].mxu0 }
 0x171   : > { %v1115_v2 = vadd.f32 %v1114_v0, %v2703_v60  ;;  %v1116_v4 = vpop.f32.mrb[1].mxu1  ;;  %v1004_v5 = vadd.f32 %v1003_v3, %v2705_v61  ;;  %v1005_v7 = vpop.f32.mrb[2].mxu0 }
 0x172   : > { %v1117_v6 = vadd.f32 %v1116_v4, %v2707_v62  ;;  %v1118_v8 = vpop.f32.mrb[2].mxu1  ;;  %v1006_v9 = vadd.f32 %v1005_v7, %v2701_v59  ;;  %v1007_v11 = vpop.f32.mrb[3].mxu0 }
 0x173   : > { %v1119_v10 = vadd.f32 %v1118_v8, %v2703_v60  ;;  %v1120_v12 = vpop.f32.mrb[3].mxu1  ;;  %v1953_v13 = vpack.c.bf16 %v1004_v5, %v1002_v1  ;;  %v1008_v15 = vadd.f32 %v1007_v11, %v2705_v61 }
 0x174   : > { %v1954_v14 = vpack.c.bf16 %v1117_v6, %v1115_v2  ;;  %v1121_v16 = vadd.f32 %v1120_v12, %v2707_v62 }
 0x175   : > { %1594 = vst [vmem:[%s2718_s9] sm:$0xff] %v1953_v13  ;;  %v1956_v17 = vpack.c.bf16 %v1008_v15, %v1006_v9 }
 0x176   : > { %1595 = vst [vmem:[%s2718_s9 + $0x8] sm:$0xff] %v1954_v14  ;;  %v1957_v18 = vpack.c.bf16 %v1121_v16, %v1119_v10 }
 0x177   : > { %1597 = vst [vmem:[%s2718_s9 + $0x18] sm:$0xff] %v1956_v17  ;;  %v1011_v19 = vpop.f32.mrb[4].mxu0 }
 0x178   : > { %1598 = vst [vmem:[%s2718_s9 + $0x20] sm:$0xff] %v1957_v18  ;;  %v1124_v20 = vpop.f32.mrb[4].mxu1  ;;  %v1012_v21 = vadd.f32 %v1011_v19, %v2701_v59  ;;  %v1013_v23 = vpop.f32.mrb[5].mxu0 }
 0x179   : > { %v1125_v22 = vadd.f32 %v1124_v20, %v2703_v60  ;;  %v1126_v24 = vpop.f32.mrb[5].mxu1  ;;  %v1014_v25 = vadd.f32 %v1013_v23, %v2705_v61  ;;  %v1015_v27 = vpop.f32.mrb[6].mxu0 }
 0x17a   : > { %v1127_v26 = vadd.f32 %v1126_v24, %v2707_v62  ;;  %v1128_v28 = vpop.f32.mrb[6].mxu1  ;;  %v1016_v29 = vadd.f32 %v1015_v27, %v2701_v59  ;;  %v1017_v31 = vpop.f32.mrb[7].mxu0 }
 0x17b   : > { %v1129_v30 = vadd.f32 %v1128_v28, %v2703_v60  ;;  %v1130_v32 = vpop.f32.mrb[7].mxu1  ;;  %v1959_v33 = vpack.c.bf16 %v1014_v25, %v1012_v21  ;;  %v1018_v35 = vadd.f32 %v1017_v31, %v2705_v61 }
 0x17c   : > { %v1960_v34 = vpack.c.bf16 %v1127_v26, %v1125_v22  ;;  %v1131_v36 = vadd.f32 %v1130_v32, %v2707_v62 }
 0x17d   : > { %1600 = vst [vmem:[%s2718_s9 + $0x30] sm:$0xff] %v1959_v33  ;;  %v1962_v37 = vpack.c.bf16 %v1018_v35, %v1016_v29 }
 0x17e   : > { %1601 = vst [vmem:[%s2718_s9 + $0x38] sm:$0xff] %v1960_v34  ;;  %v1963_v38 = vpack.c.bf16 %v1131_v36, %v1129_v30 }
 0x17f   : > { %1603 = vst [vmem:[%s2718_s9 + $0x48] sm:$0xff] %v1962_v37  ;;  %v1021_v39 = vpop.f32.mrb[8].mxu0 }
 0x180   : > { %1604 = vst [vmem:[%s2718_s9 + $0x50] sm:$0xff] %v1963_v38  ;;  %v1134_v40 = vpop.f32.mrb[8].mxu1  ;;  %v1022_v41 = vadd.f32 %v1021_v39, %v2701_v59  ;;  %v1023_v43 = vpop.f32.mrb[9].mxu0 }
 0x181   : > { %v1135_v42 = vadd.f32 %v1134_v40, %v2703_v60  ;;  %v1136_v44 = vpop.f32.mrb[9].mxu1  ;;  %v1024_v45 = vadd.f32 %v1023_v43, %v2705_v61  ;;  %v1025_v47 = vpop.f32.mrb[10].mxu0 }
 0x182   : > { %v1137_v46 = vadd.f32 %v1136_v44, %v2707_v62  ;;  %v1138_v48 = vpop.f32.mrb[10].mxu1  ;;  %v1026_v49 = vadd.f32 %v1025_v47, %v2701_v59  ;;  %v1027_v51 = vpop.f32.mrb[11].mxu0 }
 0x183   : > { %v1139_v50 = vadd.f32 %v1138_v48, %v2703_v60  ;;  %v1140_v52 = vpop.f32.mrb[11].mxu1  ;;  %v1965_v55 = vpack.c.bf16 %v1024_v45, %v1022_v41  ;;  %v1028_v57 = vadd.f32 %v1027_v51, %v2705_v61 }
 0x184   : > { %v1966_v56 = vpack.c.bf16 %v1137_v46, %v1135_v42  ;;  %v1141_v58 = vadd.f32 %v1140_v52, %v2707_v62 }
 0x185   : > { %1606 = vst [vmem:[%s2718_s9 + $0x60] sm:$0xff] %v1965_v55  ;;  %v1968_v63 = vpack.c.bf16 %v1028_v57, %v1026_v49 }
 0x186   : > { %1607 = vst [vmem:[%s2718_s9 + $0x68] sm:$0xff] %v1966_v56  ;;  %v1969_v0 = vpack.c.bf16 %v1141_v58, %v1139_v50 }
 0x187   : > { %1609 = vst [vmem:[%s2718_s9 + $0x78] sm:$0xff] %v1968_v63  ;;  %v1031_v1 = vpop.f32.mrb[12].mxu0 }
 0x188   : > { %1610 = vst [vmem:[%s2718_s9 + $0x80] sm:$0xff] %v1969_v0  ;;  %v1144_v2 = vpop.f32.mrb[12].mxu1  ;;  %v1032_v3 = vadd.f32 %v1031_v1, %v2701_v59  ;;  %v1033_v5 = vpop.f32.mrb[13].mxu0 }
 0x189   : > { %v1145_v4 = vadd.f32 %v1144_v2, %v2703_v60  ;;  %v1146_v6 = vpop.f32.mrb[13].mxu1  ;;  %v1034_v7 = vadd.f32 %v1033_v5, %v2705_v61  ;;  %v1035_v9 = vpop.f32.mrb[14].mxu0 }
 0x18a   : > { %v1147_v8 = vadd.f32 %v1146_v6, %v2707_v62  ;;  %v1148_v10 = vpop.f32.mrb[14].mxu1  ;;  %v1036_v11 = vadd.f32 %v1035_v9, %v2701_v59  ;;  %v1037_v13 = vpop.f32.mrb[15].mxu0 }
 0x18b   : > { %v1149_v12 = vadd.f32 %v1148_v10, %v2703_v60  ;;  %v1150_v14 = vpop.f32.mrb[15].mxu1  ;;  %v1971_v15 = vpack.c.bf16 %v1034_v7, %v1032_v3  ;;  %v1038_v17 = vadd.f32 %v1037_v13, %v2705_v61 }
 0x18c   : > { %v1972_v16 = vpack.c.bf16 %v1147_v8, %v1145_v4  ;;  %v1151_v18 = vadd.f32 %v1150_v14, %v2707_v62 }
 0x18d   : > { %1612 = vst [vmem:[%s2718_s9 + $0x90] sm:$0xff] %v1971_v15  ;;  %v1974_v19 = vpack.c.bf16 %v1038_v17, %v1036_v11 }
 0x18e   : > { %1613 = vst [vmem:[%s2718_s9 + $0x98] sm:$0xff] %v1972_v16  ;;  %v1975_v20 = vpack.c.bf16 %v1151_v18, %v1149_v12 }
 0x18f   : > { %1615 = vst [vmem:[%s2718_s9 + $0xa8] sm:$0xff] %v1974_v19  ;;  %v1041_v21 = vpop.f32.mrb[16].mxu0 }
 0x190   : > { %1616 = vst [vmem:[%s2718_s9 + $0xb0] sm:$0xff] %v1975_v20  ;;  %v1154_v22 = vpop.f32.mrb[16].mxu1  ;;  %v1042_v23 = vadd.f32 %v1041_v21, %v2701_v59  ;;  %v1043_v25 = vpop.f32.mrb[17].mxu0 }
 0x191   : > { %v1155_v24 = vadd.f32 %v1154_v22, %v2703_v60  ;;  %v1156_v26 = vpop.f32.mrb[17].mxu1  ;;  %v1044_v27 = vadd.f32 %v1043_v25, %v2705_v61  ;;  %v1045_v29 = vpop.f32.mrb[18].mxu0 }
 0x192   : > { %v1157_v28 = vadd.f32 %v1156_v26, %v2707_v62  ;;  %v1158_v30 = vpop.f32.mrb[18].mxu1  ;;  %v1046_v31 = vadd.f32 %v1045_v29, %v2701_v59  ;;  %v1047_v33 = vpop.f32.mrb[19].mxu0 }
 0x193   : > { %v1159_v32 = vadd.f32 %v1158_v30, %v2703_v60  ;;  %v1160_v34 = vpop.f32.mrb[19].mxu1  ;;  %v1977_v35 = vpack.c.bf16 %v1044_v27, %v1042_v23  ;;  %v1048_v37 = vadd.f32 %v1047_v33, %v2705_v61 }
 0x194   : > { %v1978_v36 = vpack.c.bf16 %v1157_v28, %v1155_v24  ;;  %v1161_v38 = vadd.f32 %v1160_v34, %v2707_v62 }
 0x195   : > { %1618 = vst [vmem:[%s2718_s9 + $0xc0] sm:$0xff] %v1977_v35  ;;  %v1980_v39 = vpack.c.bf16 %v1048_v37, %v1046_v31 }
 0x196   : > { %1619 = vst [vmem:[%s2718_s9 + $0xc8] sm:$0xff] %v1978_v36  ;;  %v1981_v40 = vpack.c.bf16 %v1161_v38, %v1159_v32 }
 0x197   : > { %1621 = vst [vmem:[%s2718_s9 + $0xd8] sm:$0xff] %v1980_v39  ;;  %v1051_v41 = vpop.f32.mrb[20].mxu0 }
 0x198   : > { %1622 = vst [vmem:[%s2718_s9 + $0xe0] sm:$0xff] %v1981_v40  ;;  %v1164_v42 = vpop.f32.mrb[20].mxu1  ;;  %v1052_v43 = vadd.f32 %v1051_v41, %v2701_v59  ;;  %v1053_v45 = vpop.f32.mrb[21].mxu0 }
 0x199   : > { %v1165_v44 = vadd.f32 %v1164_v42, %v2703_v60  ;;  %v1166_v46 = vpop.f32.mrb[21].mxu1  ;;  %v1054_v47 = vadd.f32 %v1053_v45, %v2705_v61  ;;  %v1055_v49 = vpop.f32.mrb[22].mxu0 }
 0x19a   : > { %v1167_v48 = vadd.f32 %v1166_v46, %v2707_v62  ;;  %v1168_v50 = vpop.f32.mrb[22].mxu1  ;;  %v1056_v51 = vadd.f32 %v1055_v49, %v2701_v59  ;;  %v1057_v55 = vpop.f32.mrb[23].mxu0 }
 0x19b   : > { %v1169_v52 = vadd.f32 %v1168_v50, %v2703_v60  ;;  %v1170_v56 = vpop.f32.mrb[23].mxu1  ;;  %v1983_v57 = vpack.c.bf16 %v1054_v47, %v1052_v43  ;;  %v1058_v63 = vadd.f32 %v1057_v55, %v2705_v61 }
 0x19c   : > { %v1984_v58 = vpack.c.bf16 %v1167_v48, %v1165_v44  ;;  %v1171_v0 = vadd.f32 %v1170_v56, %v2707_v62 }
 0x19d   : > { %1624 = vst [vmem:[%s2718_s9 + $0xf0] sm:$0xff] %v1983_v57  ;;  %v1986_v1 = vpack.c.bf16 %v1058_v63, %v1056_v51 }
 0x19e   : > { %1625 = vst [vmem:[%s2718_s9 + $0xf8] sm:$0xff] %v1984_v58  ;;  %v1987_v2 = vpack.c.bf16 %v1171_v0, %v1169_v52 }
 0x19f   : > { %1627 = vst [vmem:[%s2718_s9 + $0x108] sm:$0xff] %v1986_v1  ;;  %v1061_v3 = vpop.f32.mrb[24].mxu0 }
 0x1a0   : > { %1628 = vst [vmem:[%s2718_s9 + $0x110] sm:$0xff] %v1987_v2  ;;  %v1174_v4 = vpop.f32.mrb[24].mxu1  ;;  %v1062_v5 = vadd.f32 %v1061_v3, %v2701_v59  ;;  %v1063_v7 = vpop.f32.mrb[25].mxu0 }
 0x1a1   : > { %v1175_v6 = vadd.f32 %v1174_v4, %v2703_v60  ;;  %v1176_v8 = vpop.f32.mrb[25].mxu1  ;;  %v1064_v9 = vadd.f32 %v1063_v7, %v2705_v61  ;;  %v1065_v11 = vpop.f32.mrb[26].mxu0 }
 0x1a2   : > { %v1177_v10 = vadd.f32 %v1176_v8, %v2707_v62  ;;  %v1178_v12 = vpop.f32.mrb[26].mxu1  ;;  %v1066_v13 = vadd.f32 %v1065_v11, %v2701_v59  ;;  %v1067_v15 = vpop.f32.mrb[27].mxu0 }
 0x1a3   : > { %v1179_v14 = vadd.f32 %v1178_v12, %v2703_v60  ;;  %v1180_v16 = vpop.f32.mrb[27].mxu1  ;;  %v1989_v17 = vpack.c.bf16 %v1064_v9, %v1062_v5  ;;  %v1068_v19 = vadd.f32 %v1067_v15, %v2705_v61 }
 0x1a4   : > { %v1990_v18 = vpack.c.bf16 %v1177_v10, %v1175_v6  ;;  %v1181_v20 = vadd.f32 %v1180_v16, %v2707_v62 }
 0x1a5   : > { %1630 = vst [vmem:[%s2718_s9 + $0x120] sm:$0xff] %v1989_v17  ;;  %v1992_v21 = vpack.c.bf16 %v1068_v19, %v1066_v13 }
 0x1a6   : > { %1631 = vst [vmem:[%s2718_s9 + $0x128] sm:$0xff] %v1990_v18  ;;  %v1993_v22 = vpack.c.bf16 %v1181_v20, %v1179_v14 }
 0x1a7   : > { %1633 = vst [vmem:[%s2718_s9 + $0x138] sm:$0xff] %v1992_v21  ;;  %v1071_v23 = vpop.f32.mrb[28].mxu0 }
 0x1a8   : > { %1634 = vst [vmem:[%s2718_s9 + $0x140] sm:$0xff] %v1993_v22  ;;  %v1184_v24 = vpop.f32.mrb[28].mxu1  ;;  %v1072_v25 = vadd.f32 %v1071_v23, %v2701_v59  ;;  %v1073_v27 = vpop.f32.mrb[29].mxu0 }
 0x1a9   : > { %v1185_v26 = vadd.f32 %v1184_v24, %v2703_v60  ;;  %v1186_v28 = vpop.f32.mrb[29].mxu1  ;;  %v1074_v29 = vadd.f32 %v1073_v27, %v2705_v61  ;;  %v1075_v31 = vpop.f32.mrb[30].mxu0 }
 0x1aa   : > { %v1187_v30 = vadd.f32 %v1186_v28, %v2707_v62  ;;  %v1188_v32 = vpop.f32.mrb[30].mxu1  ;;  %v1076_v33 = vadd.f32 %v1075_v31, %v2701_v59  ;;  %v1077_v35 = vpop.f32.mrb[31].mxu0 }
 0x1ab   : > { %v1189_v34 = vadd.f32 %v1188_v32, %v2703_v60  ;;  %v1190_v36 = vpop.f32.mrb[31].mxu1  ;;  %v1995_v37 = vpack.c.bf16 %v1074_v29, %v1072_v25  ;;  %v1078_v39 = vadd.f32 %v1077_v35, %v2705_v61 }
 0x1ac   : > { %v1996_v38 = vpack.c.bf16 %v1187_v30, %v1185_v26  ;;  %v1191_v40 = vadd.f32 %v1190_v36, %v2707_v62 }
 0x1ad   : > { %1636 = vst [vmem:[%s2718_s9 + $0x150] sm:$0xff] %v1995_v37  ;;  %v1998_v41 = vpack.c.bf16 %v1078_v39, %v1076_v33 }
 0x1ae   : > { %1637 = vst [vmem:[%s2718_s9 + $0x158] sm:$0xff] %v1996_v38  ;;  %v1999_v42 = vpack.c.bf16 %v1191_v40, %v1189_v34 }
 0x1af   : > { %1639 = vst [vmem:[%s2718_s9 + $0x168] sm:$0xff] %v1998_v41  ;;  %v1227_v43 = vpop.f32.mrb[32].mxu0 }
 0x1b0   : > { %1640 = vst [vmem:[%s2718_s9 + $0x170] sm:$0xff] %v1999_v42  ;;  %v1267_v44 = vpop.f32.mrb[32].mxu1  ;;  %v1228_v59 = vadd.f32 %v1227_v43, %v2697_v53  ;;  %v1229_v45 = vpop.f32.mrb[33].mxu0 }
 0x1b1   : > { %v1268_v60 = vadd.f32 %v1267_v44, %v2697_v53  ;;  %v1269_v46 = vpop.f32.mrb[33].mxu1  ;;  %v1230_v61 = vadd.f32 %v1229_v45, %v2699_v54  ;;  %v1231_v47 = vpop.f32.mrb[34].mxu0 }
 0x1b2   : > { %v1270_v62 = vadd.f32 %v1269_v46, %v2699_v54  ;;  %v1271_v48 = vpop.f32.mrb[34].mxu1  ;;  %v1232_v49 = vadd.f32 %v1231_v47, %v2697_v53  ;;  %v1233_v51 = vpop.f32.mrb[35].mxu0 }
 0x1b3   : > { %v1272_v50 = vadd.f32 %v1271_v48, %v2697_v53  ;;  %v1273_v52 = vpop.f32.mrb[35].mxu1  ;;  %v1955_v55 = vpack.c.bf16 %v1230_v61, %v1228_v59  ;;  %v1234_v57 = vadd.f32 %v1233_v51, %v2699_v54 }
 0x1b4   : > { %v1979_v56 = vpack.c.bf16 %v1270_v62, %v1268_v60  ;;  %v1274_v58 = vadd.f32 %v1273_v52, %v2699_v54 }
 0x1b5   : > { %1596 = vst [vmem:[%s2718_s9 + $0x10] sm:$0xff] %v1955_v55  ;;  %v1958_v63 = vpack.c.bf16 %v1234_v57, %v1232_v49 }
 0x1b6   : > { %1620 = vst [vmem:[%s2718_s9 + $0xd0] sm:$0xff] %v1979_v56  ;;  %v1982_v0 = vpack.c.bf16 %v1274_v58, %v1272_v50 }
 0x1b7   : > { %1599 = vst [vmem:[%s2718_s9 + $0x28] sm:$0xff] %v1958_v63  ;;  %v1237_v1 = vpop.f32.mrb[36].mxu0 }
 0x1b8   : > { %1623 = vst [vmem:[%s2718_s9 + $0xe8] sm:$0xff] %v1982_v0  ;;  %v1277_v2 = vpop.f32.mrb[36].mxu1  ;;  %v1238_v3 = vadd.f32 %v1237_v1, %v2697_v53  ;;  %v1239_v5 = vpop.f32.mrb[37].mxu0 }
 0x1b9   : > { %v1278_v4 = vadd.f32 %v1277_v2, %v2697_v53  ;;  %v1279_v6 = vpop.f32.mrb[37].mxu1  ;;  %v1240_v7 = vadd.f32 %v1239_v5, %v2699_v54  ;;  %v1241_v9 = vpop.f32.mrb[38].mxu0 }
 0x1ba   : > { %v1280_v8 = vadd.f32 %v1279_v6, %v2699_v54  ;;  %v1281_v10 = vpop.f32.mrb[38].mxu1  ;;  %v1242_v11 = vadd.f32 %v1241_v9, %v2697_v53  ;;  %v1243_v13 = vpop.f32.mrb[39].mxu0 }
 0x1bb   : > { %v1282_v12 = vadd.f32 %v1281_v10, %v2697_v53  ;;  %v1283_v14 = vpop.f32.mrb[39].mxu1  ;;  %v1961_v15 = vpack.c.bf16 %v1240_v7, %v1238_v3  ;;  %v1244_v17 = vadd.f32 %v1243_v13, %v2699_v54 }
 0x1bc   : > { %v1985_v16 = vpack.c.bf16 %v1280_v8, %v1278_v4  ;;  %v1284_v18 = vadd.f32 %v1283_v14, %v2699_v54 }
 0x1bd   : > { %1602 = vst [vmem:[%s2718_s9 + $0x40] sm:$0xff] %v1961_v15  ;;  %v1964_v19 = vpack.c.bf16 %v1244_v17, %v1242_v11 }
 0x1be   : > { %1626 = vst [vmem:[%s2718_s9 + $0x100] sm:$0xff] %v1985_v16  ;;  %v1988_v20 = vpack.c.bf16 %v1284_v18, %v1282_v12 }
 0x1bf   : > { %1605 = vst [vmem:[%s2718_s9 + $0x58] sm:$0xff] %v1964_v19  ;;  %v1247_v21 = vpop.f32.mrb[40].mxu0 }
 0x1c0   : > { %1629 = vst [vmem:[%s2718_s9 + $0x118] sm:$0xff] %v1988_v20  ;;  %v1287_v22 = vpop.f32.mrb[40].mxu1  ;;  %v1248_v23 = vadd.f32 %v1247_v21, %v2697_v53  ;;  %v1249_v25 = vpop.f32.mrb[41].mxu0 }
 0x1c1   : > { %v1288_v24 = vadd.f32 %v1287_v22, %v2697_v53  ;;  %v1289_v26 = vpop.f32.mrb[41].mxu1  ;;  %v1250_v27 = vadd.f32 %v1249_v25, %v2699_v54  ;;  %v1251_v29 = vpop.f32.mrb[42].mxu0 }
 0x1c2   : > { %v1290_v28 = vadd.f32 %v1289_v26, %v2699_v54  ;;  %v1291_v30 = vpop.f32.mrb[42].mxu1  ;;  %v1252_v31 = vadd.f32 %v1251_v29, %v2697_v53  ;;  %v1253_v33 = vpop.f32.mrb[43].mxu0 }
 0x1c3   : > { %v1292_v32 = vadd.f32 %v1291_v30, %v2697_v53  ;;  %v1293_v34 = vpop.f32.mrb[43].mxu1  ;;  %v1967_v35 = vpack.c.bf16 %v1250_v27, %v1248_v23  ;;  %v1254_v37 = vadd.f32 %v1253_v33, %v2699_v54 }
 0x1c4   : > { %v1991_v36 = vpack.c.bf16 %v1290_v28, %v1288_v24  ;;  %v1294_v38 = vadd.f32 %v1293_v34, %v2699_v54 }
 0x1c5   : > { %1608 = vst [vmem:[%s2718_s9 + $0x70] sm:$0xff] %v1967_v35  ;;  %v1970_v39 = vpack.c.bf16 %v1254_v37, %v1252_v31 }
 0x1c6   : > { %1632 = vst [vmem:[%s2718_s9 + $0x130] sm:$0xff] %v1991_v36  ;;  %v1994_v40 = vpack.c.bf16 %v1294_v38, %v1292_v32 }
 0x1c7   : > { %1611 = vst [vmem:[%s2718_s9 + $0x88] sm:$0xff] %v1970_v39  ;;  %v1257_v41 = vpop.f32.mrb[44].mxu0 }
 0x1c8   : > { %1635 = vst [vmem:[%s2718_s9 + $0x148] sm:$0xff] %v1994_v40  ;;  %v1297_v42 = vpop.f32.mrb[44].mxu1  ;;  %v1258_v43 = vadd.f32 %v1257_v41, %v2697_v53  ;;  %v1259_v59 = vpop.f32.mrb[45].mxu0 }
 0x1c9   : > { %v1298_v44 = vadd.f32 %v1297_v42, %v2697_v53  ;;  %v1299_v60 = vpop.f32.mrb[45].mxu1  ;;  %v1260_v45 = vadd.f32 %v1259_v59, %v2699_v54  ;;  %v1261_v61 = vpop.f32.mrb[46].mxu0 }
 0x1ca   : > { %v1300_v46 = vadd.f32 %v1299_v60, %v2699_v54  ;;  %v1301_v62 = vpop.f32.mrb[46].mxu1  ;;  %v1262_v47 = vadd.f32 %v1261_v61, %v2697_v53  ;;  %v1263_v49 = vpop.f32.mrb[47].mxu0 }
 0x1cb   : > { %v1302_v48 = vadd.f32 %v1301_v62, %v2697_v53  ;;  %v1303_v50 = vpop.f32.mrb[47].mxu1  ;;  %v1973_v51 = vpack.c.bf16 %v1260_v45, %v1258_v43  ;;  %v1264_v55 = vadd.f32 %v1263_v49, %v2699_v54 }
 0x1cc   : > { %v1997_v52 = vpack.c.bf16 %v1300_v46, %v1298_v44  ;;  %v1304_v56 = vadd.f32 %v1303_v50, %v2699_v54 }
 0x1cd   : > { %1614 = vst [vmem:[%s2718_s9 + $0xa0] sm:$0xff] %v1973_v51  ;;  %v1976_v53 = vpack.c.bf16 %v1264_v55, %v1262_v47 }
 0x1ce   : > { %1638 = vst [vmem:[%s2718_s9 + $0x160] sm:$0xff] %v1997_v52  ;;  %v2000_v57 = vpack.c.bf16 %v1304_v56, %v1302_v48 }
 0x1cf   : > { %1617 = vst [vmem:[%s2718_s9 + $0xb8] sm:$0xff] %v1976_v53 }
 0x1d0   : > { %1641 = vst [vmem:[%s2718_s9 + $0x178] sm:$0xff] %v2000_v57 }
 0x1d1   : > { %2353 = shalt.err (!%p2350_p5)
}
 0x1d2   : > { %s2354_s29 = scalar_lea.hbm %s2857_s26, 6144  ;;  %s2358_s20 = scalar_lea.hbm %s2915_s3, 12288 }
 0x1d3   : > { %p2355_p9 = scmp.ne.s32.totalorder %s2857_s26, %s2354_s29  ;;  %p2359_p3 = scmp.lt.u32.totalorder %s2857_s26, %s2915_s3 }
 0x1d4   : > { %p2360_p7 = scmp.lt.u32.totalorder %s2358_s20, %s2354_s29  ;;  %p2362_p4 = scmp.lt.u32.totalorder %s2354_s29, %s2857_s26 }
 0x1d5   : > { %p2356_p1 = pnand %p2355_p9, %p2553_p10 }
 0x1d6   : > { %p2361_p13 = por %p2360_p7, %p2359_p3 }
 0x1d7   : > { %p2357_p2 = pneg %p2356_p1 }
 0x1d8   : > { %p2363_p6 = por %p2362_p4, %p2361_p13 }
 0x1da   : > { %p2364_p8 = pnand %p2363_p6, %p2357_p2 }
 0x1dc   : > { %2367 = shalt.err (!%p2364_p8)
}
 0x1dd   : > { %s2435_s9 = smov 384   ;;  %s2436_s10 = smov 24  }
 0x1de   : > { %2041 = dma.vmem_to_hbm [thread:$0]  (%p2553_p10), %s2859_s11, 6144, %s2857_s26, %s1643_s7, %s2435_s9, %s2435_s9, %s2436_s10  }
 0x1df PF: > { %s1676_s15 = sand.u32 1, %s2406_s12   ;;  %p2933_p12 = scmp.ne.s32.totalorder %s2923_s23, 0 }
 0x1e0   : > { %p2934_p11 = scmp.ge.s32.totalorder %s2426_s17, 2  ;;  %s1677_s18 = scalar_lea.sflag [#allocation4], %s1676_s15 }
 0x1e2   : > { %p2052_p0 = pnand %p2934_p11, %p2933_p12 }
 0x1e4   : > { %2401 = dma.done.wait (!%p2052_p0), %s1677_s18, 6144  }
 0x1e5   : > { %2403 = vsyncadd (!%p2052_p0), %s1677_s18, 4294961152  ;;  %s20_s17 = sadd.s32 1, %s2426_s17   ;;  %s2935_s12 = smov %s2410_s13 }
 0x1e6   : > { %p17_p5 = scmp.ge.s32.totalorder %s20_s17, 4   ;;  %s2936_s13 = smov %s2414_s14 }
 0x1e7   : > { %s2937_s14 = smov %s2562_s5  ;;  %s2938_s15 = smov %s2422_s16 }
 0x1e8   : > { %s2939_s16 = smov %s2941_s28  ;;  %19 = sbr.rel (!%p17_p5) target bundleno = 7 (0x7), region = 85 }
 0x1ef   :  { %1682 = vsyncpa [#allocation3], 1 }
 0x1f0   :  { %1684 = vsyncpa [#allocation3 + $0x1], 1 }
 0x1f1   :  { %1685 = vsyncpa [#allocation6], 1 }
 0x1f2   :  { %1686 = vsyncpa [#allocation4], 1 }
 0x1f3   :  { %1688 = vsyncpa [#allocation4 + $0x1], 1 }

</bundles_post_ra>
